<compile_context>
chip_gen: v6e
topology: v6e:2x2x1
jax: 0.10.0
libtpu: 0.0.40
codegen_flags: <defaults>
</compile_context>

<pallas_src>
import functools

import jax
import jax.numpy as jnp
from jax import lax
from jax.experimental import pallas as pl
from jax.experimental.pallas import tpu as pltpu


# ---------------------------------------------------------------------------
# Helpers
# ---------------------------------------------------------------------------

def _vmem_limit_bytes():
    """Per-generation scoped-VMEM budget (~3/4 of physical, capped at 100 MiB)."""
    try:
        cap = pltpu.get_tpu_info().vmem_capacity_bytes
    except Exception:
        cap = 64 * 1024 * 1024          # conservative fallback (safe on v7x too)
    return int(min(cap * 3 // 4, 100 * 1024 * 1024))


def _const_spec(shape):
    """BlockSpec for a block whose index never changes: single-buffer it."""
    idx = lambda *_: (0,) * len(shape)
    try:
        return pl.BlockSpec(shape, idx, pipeline_mode=pl.Buffered(1))
    except (AttributeError, TypeError):   # older jax without pipeline_mode
        return pl.BlockSpec(shape, idx)


def _layer_norm(x, gamma, beta, eps):
    # Matches the PyTorch module exactly: (x - mean) / (std + eps) with
    # torch.Tensor.std's default Bessel correction, then gamma * out + beta.
    mean = jnp.mean(x, axis=-1, keepdims=True)
    diff = x - mean
    var = jnp.sum(diff * diff, axis=-1, keepdims=True) * (1.0 / (x.shape[-1] - 1))
    inv = pl.reciprocal(jnp.sqrt(var) + eps, approx=True)   # EUP, not VALU divide
    return gamma * (diff * inv) + beta


# ---------------------------------------------------------------------------
# Kernels
# ---------------------------------------------------------------------------

def _linear_kernel(x_ref, w_ref, b_ref, o_ref, *, compute_dtype):
    """y = x @ W_t + b over a tile of M = B*S tokens (lane-dense N)."""
    x = x_ref[...].astype(compute_dtype)
    y = jnp.dot(x, w_ref[...], preferred_element_type=jnp.float32) + b_ref[0]
    o_ref[...] = y.astype(o_ref.dtype)


def _encoder_layer_kernel(
    x_ref,                       # (1, S, H) f32 — full sequence of this batch elem
    wq_ref, bq_ref,              # (H, H) cd, (1, H) f32   (1/sqrt(d) folded in)
    wkv_ref, bkv_ref,            # (H, 2H) cd, (1, 2H) f32
    wo_ref, bo_ref,              # (H, H) cd, (1, H) f32   (attention out proj)
    g1_ref, be1_ref,             # LayerNorm 1 gamma/beta (1, H) f32
    w1_ref, b1_ref,              # FFN fc_1 (H, PF) cd, (1, PF) f32
    w2_ref, b2_ref,              # FFN fc_2 (PF, H) cd, (1, H) f32
    g2_ref, be2_ref,             # LayerNorm 2 gamma/beta (1, H) f32
    o_ref,                       # (1, TQ, H)
    *, n_heads: int, q_tile: int, eps: float, compute_dtype,
):
    S, H = x_ref.shape[1], x_ref.shape[2]
    d = H // n_heads
    cd = compute_dtype
    f32 = jnp.float32

    q_start = pl.multiple_of(pl.program_id(1) * q_tile, q_tile)
    x_q = x_ref[0, pl.ds(q_start, q_tile), :]        # (TQ, H) f32 (residual path)
    x_all = x_ref[0]                                  # (S, H)  f32

    # --- lane-dense projections (MXU N = H / 2H, f32 accumulation) -----------
    q = jnp.dot(x_q.astype(cd), wq_ref[...],
                preferred_element_type=f32) + bq_ref[0]          # (TQ, H)
    kv = jnp.dot(x_all.astype(cd), wkv_ref[...],
                 preferred_element_type=f32) + bkv_ref[0]        # (S, 2H)
    k = kv[:, :H]
    v = kv[:, H:]

    # --- per-head scaled-dot-product attention (2-D MXU matmuls) -------------
    # TODO(synk): optional trg_mask (masked_fill before softmax) not implemented.
    ctx_parts = []
    for h in range(n_heads):                          # static unroll, nh small
        sl = slice(h * d, (h + 1) * d)
        qh = q[:, sl].astype(cd)                      # (TQ, d)
        kh = k[:, sl].astype(cd)                      # (S, d)
        vh = v[:, sl].astype(cd)                      # (S, d)
        e = lax.dot_general(qh, kh, (((1,), (1,)), ((), ())),
                            preferred_element_type=f32)          # (TQ, S) f32
        m = jnp.max(e, axis=-1, keepdims=True)
        p = jnp.exp(e - m)                                        # f32 softmax
        l = jnp.sum(p, axis=-1, keepdims=True)
        c = jnp.dot(p.astype(cd), vh, preferred_element_type=f32)  # (TQ, d)
        # normalize AFTER PV: TQ*d multiplies instead of TQ*S, EUP reciprocal.
        ctx_parts.append(c * pl.reciprocal(l, approx=True))
    ctx = jnp.concatenate(ctx_parts, axis=-1)                     # (TQ, H) f32

    # --- head merge + output projection: one full-K (K=H) MXU contraction ----
    attn = jnp.dot(ctx.astype(cd), wo_ref[...],
                   preferred_element_type=f32) + bo_ref[0]        # (TQ, H)

    # --- residual + LayerNorm 1 (f32) -----------------------------------------
    h1 = _layer_norm(x_q + attn, g1_ref[0], be1_ref[0], eps)

    # --- position-wise feed-forward (Conv1d k=1 == per-token Linear) ---------
    ff = jnp.maximum(
        jnp.dot(h1.astype(cd), w1_ref[...], preferred_element_type=f32)
        + b1_ref[0], 0.0)
    ff = jnp.dot(ff.astype(cd), w2_ref[...],
                 preferred_element_type=f32) + b2_ref[0]

    # --- residual + LayerNorm 2 (f32) -----------------------------------------
    out = _layer_norm(h1 + ff, g2_ref[0], be2_ref[0], eps)
    o_ref[0] = out.astype(o_ref.dtype)


# ---------------------------------------------------------------------------
# Wrappers
# ---------------------------------------------------------------------------

def _linear(x2d, w_t, b, *, compute_dtype, vmem_limit, block_m=512):
    """Token-wise linear over (M, d_in); tiled + 'parallel' over M = B*S."""
    M, d_in = x2d.shape
    d_out = w_t.shape[1]
    tm = min(block_m, M)
    kernel = functools.partial(_linear_kernel, compute_dtype=compute_dtype)
    return pl.pallas_call(
        kernel,
        out_shape=jax.ShapeDtypeStruct((M, d_out), x2d.dtype),
        grid_spec=pltpu.PrefetchScalarGridSpec(
            num_scalar_prefetch=0,
            grid=(pl.cdiv(M, tm),),
            in_specs=[
                pl.BlockSpec((tm, d_in), lambda i: (i, 0)),
                _const_spec((d_in, d_out)),
                _const_spec((1, d_out)),
            ],
            out_specs=pl.BlockSpec((tm, d_out), lambda i: (i, 0)),
        ),
        compiler_params=pltpu.CompilerParams(
            dimension_semantics=("parallel",),
            vmem_limit_bytes=vmem_limit),
    )(x2d, w_t.astype(compute_dtype), b.reshape(1, d_out).astype(jnp.float32))


def _encoder_layer(x, lp, *, n_heads, compute_dtype, vmem_limit,
                   q_tile=256, eps=1e-12):
    B, S, H = x.shape
    assert H % n_heads == 0
    d = H // n_heads
    PF = lp["w1_t"].shape[1]
    tq = min(q_tile, S)
    assert S % tq == 0, "sequence length must be a multiple of the q tile"
    nq = S // tq
    scale = jnp.sqrt(jnp.float32(d))
    cd = compute_dtype
    row = lambda v: v.reshape(1, -1).astype(jnp.float32)

    # Host-side weight staging (free at trace time): fold the attention scale
    # into W_q/b_q, fuse K/V weights along the lane axis, cast MXU operands.
    wq = (lp["wq_t"] / scale).astype(cd)                               # (H, H)
    bq = row(lp["bq"] / scale)                                         # (1, H)
    wkv = jnp.concatenate([lp["wk_t"], lp["wv_t"]], axis=1).astype(cd)  # (H, 2H)
    bkv = jnp.concatenate([lp["bk"], lp["bv"]]).reshape(1, 2 * H).astype(jnp.float32)
    wo = lp["wf_t"].astype(cd)                                         # (H, H)
    w1 = lp["w1_t"].astype(cd)                                         # (H, PF)
    w2 = lp["w2_t"].astype(cd)                                         # (PF, H)

    kernel = functools.partial(_encoder_layer_kernel, n_heads=n_heads,
                               q_tile=tq, eps=eps, compute_dtype=cd)

    x_spec = pl.BlockSpec((1, S, H), lambda b, qi: (b, 0, 0))
    o_spec = pl.BlockSpec((1, tq, H), lambda b, qi: (b, qi, 0))

    return pl.pallas_call(
        kernel,
        out_shape=jax.ShapeDtypeStruct((B, S, H), x.dtype),
        grid_spec=pltpu.PrefetchScalarGridSpec(
            num_scalar_prefetch=0,
            grid=(B, nq),
            in_specs=[
                x_spec,
                _const_spec((H, H)), _const_spec((1, H)),          # wq, bq
                _const_spec((H, 2 * H)), _const_spec((1, 2 * H)),  # wkv, bkv
                _const_spec((H, H)), _const_spec((1, H)),          # wo, bo
                _const_spec((1, H)), _const_spec((1, H)),          # ln1 g, b
                _const_spec((H, PF)), _const_spec((1, PF)),        # ffn w1, b1
                _const_spec((PF, H)), _const_spec((1, H)),         # ffn w2, b2
                _const_spec((1, H)), _const_spec((1, H)),          # ln2 g, b
            ],
            out_specs=o_spec,
        ),
        compiler_params=pltpu.CompilerParams(
            dimension_semantics=("parallel", "parallel"),
            vmem_limit_bytes=vmem_limit),
    )(x, wq, bq, wkv, bkv, wo, row(lp["bf"]),
      row(lp["g1"]), row(lp["beta1"]),
      w1, row(lp["b1"]), w2, row(lp["b2"]),
      row(lp["g2"]), row(lp["beta2"]))


def encoder_forward(trg, params, *, n_heads, compute_dtype=jnp.bfloat16,
                    q_tile=256):
    """Full Encoder forward: tiled ft linear then n_layers fused layer kernels."""
    B, S, dna_dim = trg.shape
    H = params["ft_w_t"].shape[1]
    vlim = _vmem_limit_bytes()
    x = _linear(trg.reshape(B * S, dna_dim), params["ft_w_t"], params["ft_b"],
                compute_dtype=compute_dtype, vmem_limit=vlim)
    x = x.reshape(B, S, H)
    for lp in params["layers"]:
        x = _encoder_layer(x, lp, n_heads=n_heads, compute_dtype=compute_dtype,
                           vmem_limit=vlim, q_tile=q_tile)
    return x


# ---------------------------------------------------------------------------
# Pure-JAX reference (mirrors the PyTorch forward, eval mode, mask=None)
# ---------------------------------------------------------------------------

def _reference_layer_norm(x, g, b, eps=1e-12):
    mean = jnp.mean(x, axis=-1, keepdims=True)
    std = jnp.std(x, axis=-1, keepdims=True, ddof=1)   # torch.std is unbiased
    return g * ((x - mean) / (std + eps)) + b


def _reference_encoder(trg, params, *, n_heads):
    x = trg @ params["ft_w_t"] + params["ft_b"]
    B, S, H = x.shape
    d = H // n_heads
    for p in params["layers"]:
        Q = x @ p["wq_t"] + p["bq"]
        K = x @ p["wk_t"] + p["bk"]
        V = x @ p["wv_t"] + p["bv"]

        def split(t):
            return t.reshape(B, S, n_heads, d).transpose(0, 2, 1, 3)

        Qh, Kh, Vh = split(Q), split(K), split(V)
        energy = jnp.einsum("bhqd,bhkd->bhqk", Qh, Kh) / jnp.sqrt(jnp.float32(d))
        attn = jax.nn.softmax(energy, axis=-1)
        ctx = jnp.einsum("bhqk,bhkd->bhqd", attn, Vh)
        ctx = ctx.transpose(0, 2, 1, 3).reshape(B, S, H)
        sa = ctx @ p["wf_t"] + p["bf"]
        h1 = _reference_layer_norm(x + sa, p["g1"], p["beta1"])
        ff = jax.nn.relu(h1 @ p["w1_t"] + p["b1"]) @ p["w2_t"] + p["b2"]
        x = _reference_layer_norm(h1 + ff, p["g2"], p["beta2"])
    return x


# ---------------------------------------------------------------------------
# Synthetic deterministic parameters
# ---------------------------------------------------------------------------

def _init_params(key, dna_dim, hid_dim, pf_dim, n_layers):
    def linear(k, d_in, d_out):
        kw, kb = jax.random.split(k)
        s = 1.0 / jnp.sqrt(jnp.float32(d_in))
        w_t = jax.random.uniform(kw, (d_in, d_out), jnp.float32, -s, s)  # W^T
        b = jax.random.uniform(kb, (d_out,), jnp.float32, -s, s)
        return w_t, b

    keys = jax.random.split(key, n_layers + 1)
    ft_w_t, ft_b = linear(keys[0], dna_dim, hid_dim)
    layers = []
    for i in range(n_layers):
        lk = jax.random.split(keys[i + 1], 8)
        wq_t, bq = linear(lk[0], hid_dim, hid_dim)
        wk_t, bk = linear(lk[1], hid_dim, hid_dim)
        wv_t, bv = linear(lk[2], hid_dim, hid_dim)
        wf_t, bf = linear(lk[3], hid_dim, hid_dim)
        w1_t, b1 = linear(lk[4], hid_dim, pf_dim)   # Conv1d(hid, pf, 1) as Linear
        w2_t, b2 = linear(lk[5], pf_dim, hid_dim)   # Conv1d(pf, hid, 1) as Linear
        g1 = 1.0 + 0.1 * jax.random.normal(jax.random.fold_in(lk[6], 0), (hid_dim,))
        beta1 = 0.1 * jax.random.normal(jax.random.fold_in(lk[6], 1), (hid_dim,))
        g2 = 1.0 + 0.1 * jax.random.normal(jax.random.fold_in(lk[7], 0), (hid_dim,))
        beta2 = 0.1 * jax.random.normal(jax.random.fold_in(lk[7], 1), (hid_dim,))
        layers.append(dict(wq_t=wq_t, bq=bq, wk_t=wk_t, bk=bk, wv_t=wv_t, bv=bv,
                           wf_t=wf_t, bf=bf, w1_t=w1_t, b1=b1, w2_t=w2_t, b2=b2,
                           g1=g1, beta1=beta1, g2=g2, beta2=beta2))
    return dict(ft_w_t=ft_w_t, ft_b=ft_b, layers=layers)


if __name__ == "__main__":
    B, S = 2, 8
    dna_dim, hid_dim, pf_dim = 16, 32, 64
    n_layers, n_heads = 2, 4

    root = jax.random.PRNGKey(0)
    kp, kx = jax.random.split(root)
    params = _init_params(kp, dna_dim, hid_dim, pf_dim, n_layers)
    trg = jax.random.normal(kx, (B, S, dna_dim), jnp.float32)

    ref = _reference_encoder(trg, params, n_heads=n_heads)

    # Exact-math path (f32 MXU operands): tight numerical check of the kernel.
    out_f32 = jax.block_until_ready(
        encoder_forward(trg, params, n_heads=n_heads, compute_dtype=jnp.float32))
    assert out_f32.shape == (B, S, hid_dim)
    err_f32 = jnp.max(jnp.abs(out_f32 - ref))
    assert jnp.allclose(out_f32, ref, atol=5e-3, rtol=5e-3), (
        f"f32 path mismatch vs reference: max abs err = {err_f32}")

    # Mixed-precision path (bf16 MXU operands, f32 accum / softmax / LayerNorm).
    out_bf16 = jax.block_until_ready(
        encoder_forward(trg, params, n_heads=n_heads, compute_dtype=jnp.bfloat16))
    err_bf16 = jnp.max(jnp.abs(out_bf16 - ref))
    assert jnp.allclose(out_bf16, ref, atol=5e-2, rtol=5e-2), (
        f"bf16 path mismatch vs reference: max abs err = {err_bf16}")

    print("KERNEL_OK")
</pallas_src>

<mosaic_0001>
module attributes {stable_mosaic.version = 11 : i64} {
  func.func @_linear_kernel(%arg0: i32, %arg1: memref<16x16xf32, #tpu.memory_space<vmem>>, %arg2: memref<16x32xf32, #tpu.memory_space<vmem>>, %arg3: memref<1x32xf32, #tpu.memory_space<vmem>>, %arg4: memref<16x32xf32, #tpu.memory_space<vmem>>) attributes {dimension_semantics = [#tpu.dimension_semantics<parallel>], iteration_bounds = array<i64: 1>, scalar_prefetch = 0 : i64, scratch_operands = 0 : i64, tpu.core_type = #tpu.core_type<tc>, window_params = [{transform_indices = @transform_0, window_bounds = array<i64: 16, 16>}, {pipeline_mode = #tpu.pipeline_mode<synchronous>, transform_indices = @transform_1, window_bounds = array<i64: 16, 32>}, {pipeline_mode = #tpu.pipeline_mode<synchronous>, transform_indices = @transform_2, window_bounds = array<i64: 1, 32>}, {transform_indices = @transform_3, window_bounds = array<i64: 16, 32>}]} {
    %c0 = arith.constant 0 : index
    %c0_0 = arith.constant 0 : index
    %0 = vector.load %arg1[%c0, %c0_0] : memref<16x16xf32, #tpu.memory_space<vmem>>, vector<16x16xf32>
    %c0_1 = arith.constant 0 : index
    %c0_2 = arith.constant 0 : index
    %1 = vector.load %arg2[%c0_1, %c0_2] : memref<16x32xf32, #tpu.memory_space<vmem>>, vector<16x32xf32>
    %cst = arith.constant dense<0.000000e+00> : vector<16x32xf32>
    %2 = tpu.matmul %0, %1, %cst {dimension_numbers = #tpu.dot_dimension_numbers<[1], [0], [0], [1], [0, 0, 1, 1], [], []>} : vector<16x16xf32>, vector<16x32xf32>, vector<16x32xf32> -> vector<16x32xf32>
    %c0_3 = arith.constant 0 : index
    %c0_4 = arith.constant 0 : index
    %3 = vector.load %arg3[%c0_3, %c0_4] : memref<1x32xf32, #tpu.memory_space<vmem>>, vector<1x32xf32>
    %4 = vector.shape_cast %3 : vector<1x32xf32> to vector<32xf32>
    %5 = vector.shape_cast %4 : vector<32xf32> to vector<1x32xf32>
    %6 = vector.broadcast %5 : vector<1x32xf32> to vector<16x32xf32>
    %7 = arith.addf %2, %6 : vector<16x32xf32>
    %c0_5 = arith.constant 0 : index
    %c0_6 = arith.constant 0 : index
    %8 = vector.load %arg4[%c0_5, %c0_6] : memref<16x32xf32, #tpu.memory_space<vmem>>, vector<16x32xf32>
    tpu.vector_store %arg4[%c0_5, %c0_6], %7 {strides = array<i32>} : memref<16x32xf32, #tpu.memory_space<vmem>>, vector<16x32xf32>,
    return
  }
  func.func @transform_0(%arg0: i32) -> (i32, i32) {
    %c0_i32 = arith.constant 0 : i32
    %c0_i32_0 = arith.constant 0 : i32
    return %arg0, %c0_i32 : i32, i32
  }
  func.func @transform_1(%arg0: i32) -> (i32, i32) {
    %c0_i32 = arith.constant 0 : i32
    %c0_i32_0 = arith.constant 0 : i32
    %c0_i32_1 = arith.constant 0 : i32
    return %c0_i32, %c0_i32_0 : i32, i32
  }
  func.func @transform_2(%arg0: i32) -> (i32, i32) {
    %c0_i32 = arith.constant 0 : i32
    %c0_i32_0 = arith.constant 0 : i32
    %c0_i32_1 = arith.constant 0 : i32
    return %c0_i32, %c0_i32_0 : i32, i32
  }
  func.func @transform_3(%arg0: i32) -> (i32, i32) {
    %c0_i32 = arith.constant 0 : i32
    %c0_i32_0 = arith.constant 0 : i32
    return %arg0, %c0_i32 : i32, i32
  }
}

</mosaic_0001>

<bundles_post_ra>
// kernel: tpu_custom_call.1
= control target key start
LH: loop header
LB: loop body
LE: loop exit
PB: predicated region body
PF: predicated region fallthrough
CT: control target
= control target key end

     0   :  { %8 = vsyncpa [#allocation3], 0  ;;  %s288_s0 = inlined_call_operand.hbm [shape: f32[16,16], index: 0, kind: input, shape index: {}]   ;;  %s289_s1 = inlined_call_operand.hbm [shape: f32[16,32], index: 1, kind: input, shape index: {}]   ;;  %s290_s2 = inlined_call_operand.vmem [shape: f32[1,32], index: 2, kind: input, shape index: {}]   ;;  %s291_s3 = inlined_call_operand.hbm [shape: f32[16,32], index: 3, kind: output, shape index: {}]  }
   0x1   :  { %9 = vsyncpa [#allocation6], 0 }
   0x2   :  { %10 = vsyncpa [#allocation4], 0  ;;  %s242_s12 = smov [#allocation2]  }
   0x3   :  { %s16_s13 = sshll.u32 %s242_s12, 4  ;;  %s17_s13 = int_to_ptr.vmem [resolvable:$true] %s16_s13 }
   0x4   :  { %s184_s14 = scalar_lea.vmem %s17_s13, 256  ;;  %p189_p1 = scmp.lt.s32.totalorder %s17_s13, %s17_s13 }
   0x5   :  { %p185_p0 = scmp.ne.s32.totalorder %s17_s13, %s184_s14  ;;  %p190_p2 = scmp.lt.s32.totalorder %s184_s14, %s184_s14 }
   0x7   :  { %p191_p3 = por %p190_p2, %p189_p1 }
   0x9   :  { %p192_p4 = pnand %p191_p3, %p185_p0 }
   0xb   :  { %195 = shalt.err (!%p192_p4)
}
   0xc   :  { %s243_s15 = smov 128   ;;  %s244_s16 = smov 8  }
   0xd   :  { %22 = dma.hbm_to_vmem [thread:$0]  %s288_s0, 256, %s17_s13, [#allocation3], %s243_s15, %s243_s15, %s244_s16  }
   0xe   :  { %s245_s19 = smov [#allocation5]  }
   0xf   :  { %s28_s20 = sshll.u32 %s245_s19, 4  ;;  %s29_s20 = int_to_ptr.vmem [resolvable:$true] %s28_s20 }
  0x10   :  { %s204_s21 = scalar_lea.vmem %s29_s20, 256  ;;  %p209_p6 = scmp.lt.s32.totalorder %s29_s20, %s29_s20 }
  0x11   :  { %p205_p5 = scmp.ne.s32.totalorder %s29_s20, %s204_s21  ;;  %p210_p7 = scmp.lt.s32.totalorder %s204_s21, %s204_s21 }
  0x13   :  { %p211_p8 = por %p210_p7, %p209_p6 }
  0x15   :  { %p212_p9 = pnand %p211_p8, %p205_p5 }
  0x17   :  { %215 = shalt.err (!%p212_p9)
}
  0x18   :  { %34 = dma.hbm_to_vmem [thread:$0]  %s289_s1, 256, %s29_s20, [#allocation6], %s243_s15, %s243_s15, %s244_s16  }
  0x19   :  { %236 = dma.done.wait [#allocation3], 256  }
  0x1a   :  { %237 = vsyncadd [#allocation3], 4294967040 }
  0x1b   :  { %238 = dma.done.wait [#allocation6], 256  }
  0x1c   :  { %239 = vsyncadd [#allocation6], 4294967040  ;;  %vm54_vm0 = vcmask 130048   ;;  %v46_v0 = vld [vmem:[#allocation5 + $0x8] sm:$0xff]  ;;  %v45_v1 = vld [vmem:[#allocation5] sm:$0xff]  ;;  %vm136_vm1 = vcmask 261120  }
  0x1d   :  { %v43_v2 = vld [vmem:[#allocation2] sm:$0xff]  ;;  %164 = vmatprep.subr.mxu0 %v46_v0  ;;  %v44_v3 = vld [vmem:[#allocation2 + $0x8] sm:$0xff]  ;;  %s246_s1 = smov [#allocation7]  }
  0x1e   :  { %168 = vmatprep.mubr.msk.f32.mxu0 %vm54_vm0, %v43_v2  ;;  %165 = vmatpush3.msra.mxu0 %v46_v0  ;;  %v157_v4 = vld [vmem:[%s290_s2] ss:$0 sm:$0xff]  ;;  %s144_s25 = sshll.u32 %s246_s1, 4  ;;  %s145_s25 = int_to_ptr.vmem [resolvable:$true] %s144_s25 }
  0x1f   :  { %166 = vmatprep.subr.mxu0 %v45_v1  ;;  %s216_s26 = scalar_lea.vmem %s145_s25, 256  ;;  %p221_p11 = scmp.lt.s32.totalorder %s145_s25, %s145_s25 }
  0x20   :  { %167 = vmatpush3.msra.mxu0 %v45_v1  ;;  %p217_p10 = scmp.ne.s32.totalorder %s145_s25, %s216_s26  ;;  %p222_p12 = scmp.lt.s32.totalorder %s216_s26, %s216_s26 }
  0x21   :  { %169 = vmatmul.mubr.msk.f32.vlgmr.msra.gmra.mxu0 %vm54_vm0, %v44_v3 }
  0x22   :  { %p223_p13 = por %p222_p12, %p221_p11 }
  0x24   :  { %p224_p0 = pnand %p223_p13, %p217_p10 }
  0xe1   :  { %v170_v5 = vpop.f32.mrf.mxu0 }
  0xe2   :  { %v133_v6 = vadd.f32 %v170_v5, %v157_v4 }
  0xe3   :  { %v127_v7 = vpop.f32.mrf.mxu0 }
  0xe4   :  { %v128_v8 = vadd.f32 %v157_v4, %v127_v7  ;;  %138 = vst.msk [vmem:[#allocation7 + $0x8] sm:$0xff] %vm136_vm1, %v133_v6 }
  0xe6   :  { %137 = vst.msk [vmem:[#allocation7] sm:$0xff] %vm136_vm1, %v128_v8 }
  0xe7   :  { %227 = shalt.err (!%p224_p0)
}
  0xe8   :  { %150 = dma.vmem_to_hbm [thread:$0]  %s145_s25, 256, %s291_s3, [#allocation4], %s243_s15, %s243_s15, %s244_s16  }
  0xe9   :  { %240 = dma.done.wait [#allocation4], 256  }
  0xea   :  { %241 = vsyncadd [#allocation4], 4294967040 }
  0xeb   :  { %154 = vsyncpa [#allocation3], 1 }
  0xec   :  { %155 = vsyncpa [#allocation6], 1 }
  0xed   :  { %156 = vsyncpa [#allocation4], 1 }

</bundles_post_ra>
